<compile_context>
chip_gen: v7x
topology: tpu7x:2x2x1
jax: 0.10.0
libtpu: 0.0.40
codegen_flags: <defaults>
</compile_context>

<pallas_src>
import jax
import jax.numpy as jnp
from jax.experimental import pallas as pl
from jax.experimental.pallas import tpu as pltpu


def gnn_kernel(at_ref,     # (N, N)  f32  A_hat^T
               act_ref,    # (32, N) f32  rows 0:16 = (X W1)^T, rows 16:32 = dropout mask
               w_ref,      # (16, 34) f32 [:,0:16]=W2^T [:,16]=b1 [:,17]=b2 [:,18:34]=[W3^T;Wv^T] padded
               out_ref):   # (2, N)  f32  row 0 = choice, row 1 = value (pre-bias)
    At = at_ref[...]                                   # (N, N)

    z    = act_ref[0:16, :]                            # (16, N) = (X @ W1)^T
    drop = act_ref[16:32, :]                           # (16, N) scaled keep-mask (p=0.5)
    w2t  = w_ref[:, 0:16]                              # (16, 16)
    b1   = w_ref[:, 16:17]                             # (16, 1)
    b2   = w_ref[:, 17:18]                             # (16, 1)
    wcp  = w_ref[:, 18:34]                             # (16, 16): rows 0/1 = W3^T / Wv^T, rest 0

    # conv1: H1^T = (X W1)^T A^T + b1  -> relu -> dropout (training mode, p=0.5)
    h = jnp.dot(z, At, preferred_element_type=jnp.float32) + b1
    h = jnp.maximum(h, 0.0) * drop

    # conv2: H2^T = (W2^T H1^T) A^T + b2  -> relu
    g = jnp.dot(w2t, h, preferred_element_type=jnp.float32)
    h2 = jnp.maximum(jnp.dot(g, At, preferred_element_type=jnp.float32) + b2, 0.0)

    # fused conv3 + value head: t rows 0/1 = W3^T H2^T / Wv^T H2^T (rest zero)
    t = jnp.dot(wcp, h2, preferred_element_type=jnp.float32)     # (16, N)
    u = jnp.dot(t, At, preferred_element_type=jnp.float32)       # (16, N)

    # choice = softmax over nodes of conv3 logits (b3 dropped: softmax shift-invariant)
    c = u[0:1, :]
    m = jnp.max(c, axis=-1, keepdims=True)
    e = jnp.exp(c - m)
    choice = e / jnp.sum(e, axis=-1, keepdims=True)              # (1, N)

    # value head (pre-bias): mean over nodes of Wv^T H2^T (bv added in the wrapper)
    vmean = jnp.mean(t[1:2, :], axis=-1, keepdims=True)          # (1, 1)

    out_ref[0:1, :] = choice
    out_ref[1:2, :] = jnp.broadcast_to(vmean, choice.shape)


def build_normalized_adjacency(edge_index, n_nodes):
    """PyG gcn_norm: add self-loops, A_hat[i,j] = d_i^-1/2 * d_j^-1/2 for edge j->i."""
    # Note: duplicate edges / pre-existing self-loops would double-count vs PyG.
    src = edge_index[0]
    dst = edge_index[1]
    loop = jnp.arange(n_nodes, dtype=edge_index.dtype)
    src = jnp.concatenate([src, loop])
    dst = jnp.concatenate([dst, loop])
    A = jnp.zeros((n_nodes, n_nodes), jnp.float32).at[dst, src].add(1.0)
    deg = jnp.sum(A, axis=1)
    dinv = jnp.where(deg > 0, 1.0 / jnp.sqrt(deg), 0.0)
    return dinv[:, None] * A * dinv[None, :]


@jax.jit
def _gnn_forward_impl(x, edge_index, params, key):
    n, _ = x.shape
    w1, b1, w2, b2, w3, b3, wv, bv = params

    a_hat_t = build_normalized_adjacency(edge_index, n).T        # (N, N) f32

    # conv1 dense GEMM folded into the wrapper (fuses under jit).
    z = (x @ w1).T                                               # (16, N)

    # dropout mask (p=0.5, training mode), scaled by 1/(1-p).
    # TODO(synk): matches torch dropout's distribution/scaling, not its RNG
    # stream, and is always in training mode, as in the reference forward.
    keep = jax.random.bernoulli(key, 0.5, (16, n))
    drop = keep.astype(jnp.float32) * 2.0
    act = jnp.concatenate([z, drop], axis=0)                     # (32, N)

    # pack remaining small weights/biases into one slab (16, 34)
    wct = jnp.concatenate([w3.T, wv.T], axis=0)                  # (2, 16)
    wcp = jnp.zeros((16, 16), jnp.float32).at[0:2, :].set(wct)   # padded to one MXU block
    wslab = jnp.concatenate(
        [w2.T, b1.reshape(-1, 1), b2.reshape(-1, 1), wcp], axis=1)  # (16, 34)

    vmem = pl.BlockSpec(memory_space=pltpu.MemorySpace.VMEM)

    out = pl.pallas_call(
        gnn_kernel,
        out_shape=jax.ShapeDtypeStruct((2, n), jnp.float32),
        in_specs=[vmem, vmem, vmem],
        out_specs=vmem,
    )(a_hat_t, act, wslab)

    choice = out[0]                                   # (N,)
    value = out[1, 0] + bv.reshape(())                # bv added outside the kernel
    return choice, value


def gnn_forward(x, edge_index, params, seed=0):
    key = jax.random.PRNGKey(seed)
    return _gnn_forward_impl(x, edge_index, params, key)


def init_params(key, n_node_features):
    d = n_node_features
    ks = jax.random.split(key, 8)
    scale = 0.1
    w1 = scale * jax.random.normal(ks[0], (d, 16), jnp.float32)
    b1 = scale * jax.random.normal(ks[1], (1, 16), jnp.float32)
    w2 = scale * jax.random.normal(ks[2], (16, 16), jnp.float32)
    b2 = scale * jax.random.normal(ks[3], (1, 16), jnp.float32)
    w3 = scale * jax.random.normal(ks[4], (16, 1), jnp.float32)
    b3 = scale * jax.random.normal(ks[5], (1, 1), jnp.float32)
    wv = scale * jax.random.normal(ks[6], (16, 1), jnp.float32)   # activ2 weight^T
    bv = scale * jax.random.normal(ks[7], (1, 1), jnp.float32)
    # Note: activ1 (16 -> n_nodes) exists in __init__ but is unused in forward.
    return (w1, b1, w2, b2, w3, b3, wv, bv)


if __name__ == "__main__":
    n_nodes = 8
    n_node_features = 4

    key = jax.random.PRNGKey(0)
    k_x, k_p = jax.random.split(key)

    # node features
    x = jax.random.normal(k_x, (n_nodes, n_node_features), jnp.float32)

    # undirected ring graph: i <-> (i+1) % n_nodes, edge_index shape (2, 16)
    i = jnp.arange(n_nodes, dtype=jnp.int32)
    j = (i + 1) % n_nodes
    edge_index = jnp.stack([jnp.concatenate([i, j]),
                            jnp.concatenate([j, i])], axis=0)

    params = init_params(k_p, n_node_features)

    choice, value = gnn_forward(x, edge_index, params, seed=0)
    choice = jax.block_until_ready(choice)
    value = jax.block_until_ready(value)

    assert choice.shape == (n_nodes,)
    assert value.shape == ()
    assert bool(jnp.isclose(jnp.sum(choice), 1.0, atol=1e-5))
    assert bool(jnp.all(jnp.isfinite(choice)))
    assert bool(jnp.isfinite(value))

    print("KERNEL_OK")
</pallas_src>

<mosaic_0001>
module attributes {stable_mosaic.version = 11 : i64} {
  func.func @gnn_kernel(%arg0: memref<8x8xf32, #tpu.memory_space<vmem>>, %arg1: memref<32x8xf32, #tpu.memory_space<vmem>>, %arg2: memref<16x34xf32, #tpu.memory_space<vmem>>, %arg3: memref<2x8xf32, #tpu.memory_space<vmem>>) attributes {dimension_semantics = [], scalar_prefetch = 0 : i64, scratch_operands = 0 : i64, tpu.core_type = #tpu.core_type<tc>} {
    %c0 = arith.constant 0 : index
    %c0_0 = arith.constant 0 : index
    %0 = vector.load %arg0[%c0, %c0_0] : memref<8x8xf32, #tpu.memory_space<vmem>>, vector<8x8xf32>
    %c0_1 = arith.constant 0 : index
    %c0_2 = arith.constant 0 : index
    %1 = vector.load %arg1[%c0_1, %c0_2] : memref<32x8xf32, #tpu.memory_space<vmem>>, vector<16x8xf32>
    %c16 = arith.constant 16 : index
    %c0_3 = arith.constant 0 : index
    %2 = vector.load %arg1[%c16, %c0_3] : memref<32x8xf32, #tpu.memory_space<vmem>>, vector<16x8xf32>
    %c0_4 = arith.constant 0 : index
    %c0_5 = arith.constant 0 : index
    %3 = vector.load %arg2[%c0_4, %c0_5] : memref<16x34xf32, #tpu.memory_space<vmem>>, vector<16x16xf32>
    %c0_6 = arith.constant 0 : index
    %c16_7 = arith.constant 16 : index
    %4 = vector.load %arg2[%c0_6, %c16_7] : memref<16x34xf32, #tpu.memory_space<vmem>>, vector<16x1xf32>
    %c0_8 = arith.constant 0 : index
    %c17 = arith.constant 17 : index
    %5 = vector.load %arg2[%c0_8, %c17] : memref<16x34xf32, #tpu.memory_space<vmem>>, vector<16x1xf32>
    %c0_9 = arith.constant 0 : index
    %c18 = arith.constant 18 : index
    %6 = vector.load %arg2[%c0_9, %c18] : memref<16x34xf32, #tpu.memory_space<vmem>>, vector<16x16xf32>
    %cst = arith.constant dense<0.000000e+00> : vector<16x8xf32>
    %7 = tpu.matmul %1, %0, %cst {dimension_numbers = #tpu.dot_dimension_numbers<[1], [0], [0], [1], [0, 0, 1, 1], [], []>} : vector<16x8xf32>, vector<8x8xf32>, vector<16x8xf32> -> vector<16x8xf32>
    %8 = vector.broadcast %4 : vector<16x1xf32> to vector<16x8xf32>
    %9 = arith.addf %7, %8 : vector<16x8xf32>
    %cst_10 = arith.constant 0.000000e+00 : f32
    %10 = vector.broadcast %cst_10 : f32 to vector<16x8xf32>
    %11 = arith.maximumf %9, %10 : vector<16x8xf32>
    %12 = arith.mulf %11, %2 : vector<16x8xf32>
    %cst_11 = arith.constant dense<0.000000e+00> : vector<16x8xf32>
    %13 = tpu.matmul %3, %12, %cst_11 {dimension_numbers = #tpu.dot_dimension_numbers<[1], [0], [0], [1], [0, 0, 1, 1], [], []>} : vector<16x16xf32>, vector<16x8xf32>, vector<16x8xf32> -> vector<16x8xf32>
    %cst_12 = arith.constant dense<0.000000e+00> : vector<16x8xf32>
    %14 = tpu.matmul %13, %0, %cst_12 {dimension_numbers = #tpu.dot_dimension_numbers<[1], [0], [0], [1], [0, 0, 1, 1], [], []>} : vector<16x8xf32>, vector<8x8xf32>, vector<16x8xf32> -> vector<16x8xf32>
    %15 = vector.broadcast %5 : vector<16x1xf32> to vector<16x8xf32>
    %16 = arith.addf %14, %15 : vector<16x8xf32>
    %cst_13 = arith.constant 0.000000e+00 : f32
    %17 = vector.broadcast %cst_13 : f32 to vector<16x8xf32>
    %18 = arith.maximumf %16, %17 : vector<16x8xf32>
    %cst_14 = arith.constant dense<0.000000e+00> : vector<16x8xf32>
    %19 = tpu.matmul %6, %18, %cst_14 {dimension_numbers = #tpu.dot_dimension_numbers<[1], [0], [0], [1], [0, 0, 1, 1], [], []>} : vector<16x16xf32>, vector<16x8xf32>, vector<16x8xf32> -> vector<16x8xf32>
    %cst_15 = arith.constant dense<0.000000e+00> : vector<16x8xf32>
    %20 = tpu.matmul %19, %0, %cst_15 {dimension_numbers = #tpu.dot_dimension_numbers<[1], [0], [0], [1], [0, 0, 1, 1], [], []>} : vector<16x8xf32>, vector<8x8xf32>, vector<16x8xf32> -> vector<16x8xf32>
    %21 = vector.extract_strided_slice %20 {offsets = [0, 0], sizes = [1, 8], strides = [1, 1]} : vector<16x8xf32> to vector<1x8xf32>
    %cst_16 = arith.constant dense<0xFF800000> : vector<1xf32>
    %22 = vector.multi_reduction <maximumf>, %21, %cst_16 [1] : vector<1x8xf32> to vector<1xf32>
    %23 = vector.shape_cast %22 : vector<1xf32> to vector<1x1xf32>
    %24 = vector.broadcast %23 : vector<1x1xf32> to vector<1x8xf32>
    %25 = arith.subf %21, %24 : vector<1x8xf32>
    %26 = math.exp %25 : vector<1x8xf32>
    %cst_17 = arith.constant dense<0.000000e+00> : vector<1xf32>
    %27 = vector.multi_reduction <add>, %26, %cst_17 [1] : vector<1x8xf32> to vector<1xf32>
    %28 = vector.shape_cast %27 : vector<1xf32> to vector<1x1xf32>
    %29 = vector.broadcast %28 : vector<1x1xf32> to vector<1x8xf32>
    %30 = arith.divf %26, %29 : vector<1x8xf32>
    %31 = vector.extract_strided_slice %19 {offsets = [1, 0], sizes = [1, 8], strides = [1, 1]} : vector<16x8xf32> to vector<1x8xf32>
    %cst_18 = arith.constant dense<0.000000e+00> : vector<1xf32>
    %32 = vector.multi_reduction <add>, %31, %cst_18 [1] : vector<1x8xf32> to vector<1xf32>
    %33 = vector.shape_cast %32 : vector<1xf32> to vector<1x1xf32>
    %cst_19 = arith.constant 8.000000e+00 : f32
    %34 = vector.broadcast %cst_19 : f32 to vector<1x1xf32>
    %35 = arith.divf %33, %34 : vector<1x1xf32>
    %c0_20 = arith.constant 0 : index
    %c0_21 = arith.constant 0 : index
    %36 = vector.load %arg3[%c0_20, %c0_21] : memref<2x8xf32, #tpu.memory_space<vmem>>, vector<1x8xf32>
    tpu.vector_store %arg3[%c0_20, %c0_21], %30 {strides = array<i32>} : memref<2x8xf32, #tpu.memory_space<vmem>>, vector<1x8xf32>,
    %37 = vector.shape_cast %35 : vector<1x1xf32> to vector<1x1xf32>
    %38 = vector.broadcast %37 : vector<1x1xf32> to vector<1x8xf32>
    %c1 = arith.constant 1 : index
    %c0_22 = arith.constant 0 : index
    %39 = vector.load %arg3[%c1, %c0_22] : memref<2x8xf32, #tpu.memory_space<vmem>>, vector<1x8xf32>
    tpu.vector_store %arg3[%c1, %c0_22], %38 {strides = array<i32>} : memref<2x8xf32, #tpu.memory_space<vmem>>, vector<1x8xf32>,
    return
  }
}

</mosaic_0001>

<bundles_post_ra>
// kernel: _gnn_forward_impl.1
= control target key start
LH: loop header
LB: loop body
LE: loop exit
PB: predicated region body
PF: predicated region fallthrough
CT: control target
= control target key end

     0   :  { %vm31_vm0 = vcmask 64512   ;;  %v549_v3 = vmov 16   ;;  %vm117_vm1 = vcmask 130048   ;;  %v550_v19 = vmov 17   ;;  %s551_s24 = smov 110   ;;  %s612_s0 = inlined_call_operand.vmem [shape: f32[8,8], index: 0, kind: input, shape index: {}]   ;;  %s613_s1 = inlined_call_operand.vmem [shape: f32[32,8], index: 1, kind: input, shape index: {}]   ;;  %s614_s2 = inlined_call_operand.vmem [shape: f32[16,34], index: 2, kind: input, shape index: {}]   ;;  %s615_s3 = inlined_call_operand.vmem [shape: f32[2,8], index: 3, kind: output, shape index: {}]  }
   0x1   :  { %v14_v0 = vld [vmem:[%s612_s0] sm:$0xff]  ;;  %v16_v2 = vld [vmem:[%s613_s1 + $0x8] sm:$0xff]  ;;  %542 = vset.pattern.permute.xlu0 %v549_v3  ;;  %v18_v11 = vld [vmem:[%s613_s1 + $0x18] sm:$0xff]  ;;  %543 = vset.pattern.permute.xlu1 %v550_v19  ;;  %vm451_vm2 = vcmask 57344   ;;  %vm463_vm3 = vcmask 58369  }
   0x2   :  { %v15_v1 = vld [vmem:[%s613_s1] sm:$0xff]  ;;  %502 = vmatprep.subr.mxu0 %v14_v0  ;;  %v20_v5 = vld [vmem:[%s614_s2 + $0x8] sm:$0xff]  ;;  %v17_v14 = vld [vmem:[%s613_s1 + $0x10] sm:$0xff] }
   0x3   :  { %504 = vmatprep.mubr.msk.f32.mxu0 %vm31_vm0, %v15_v1  ;;  %v19_v4 = vld [vmem:[%s614_s2] sm:$0xff]  ;;  %503 = vmatpush3.msra.mxu0 %v14_v0 }
   0x4   :  { %23 = vperm.xlu0 %542, %v19_v4   ;;  %505 = vmatmul.mubr.msk.f32.vlgmr.msra.gmra.mrb[0].mxu0 %vm31_vm0, %v16_v2 }
   0x5   :  { %514 = vmatprep.subr.mxu0 %v14_v0  ;;  %511 = vmatprep.mubr.msk.f32.mxu1 %vm117_vm1, %v19_v4 }
   0x6   :  { %515 = vmatpush3.msra.mxu0 %v14_v0  ;;  %198 = vperm.xlu1 %543, %v19_v4  }
   0x7   :  { %526 = vmatprep.subr.mxu0 %v14_v0 }
   0x8   :  { %28 = vperm.xlu0 %542, %v20_v5  }
   0xa   :  { %202 = vperm.xlu1 %543, %v20_v5  }
   0xc   :  { %288 = vrot.lane.b32.xlu0 %v19_v4, %s551_s24 }
   0xd   :  { %544 = vset.pattern.permute.xlu0 %v550_v19 }
   0xe   :  { %290 = vrot.lane.b32.xlu1 %v20_v5, %s551_s24 }
  0x83   :  { %v24_v6 = vpop.permute.xlu0 %23 }
  0x85   :  { %v199_v23 = vpop.permute.xlu1 %198 }
  0x87   :  { %v29_v7 = vpop.permute.xlu0 %28 }
  0x89   :  { %v203_v24 = vpop.permute.xlu1 %202 }
  0x8b   :  { %v289_v22 = vpop.permute.xlu0 %288 }
  0x8d   :  { %v291_v32 = vpop.permute.xlu1 %290 }
  0xd7   :  { %v506_v8 = vpop.f32.mrb[0].mxu0 }
  0xd8   :  { %v110_v9 = vadd.f32 %v506_v8, %v29_v7  ;;  %v104_v10 = vpop.f32.mrb[1].mxu0 }
  0xd9   :  { %v105_v12 = vadd.f32 %v104_v10, %v24_v6 }
  0xda   :  { %v114_v13 = vmax.f32 %v110_v9, 0.0 }
  0xdb   :  { %v113_v15 = vmax.f32 %v105_v12, 0.0 }
  0xdc   :  { %v116_v16 = vmul.f32 %v114_v13, %v18_v11 }
  0xdd   :  { %v115_v17 = vmul.f32 %v113_v15, %v17_v14 }
  0xdf   :  { %v531_v18 = vpack.c.bf16 %v116_v16, %v115_v17 }
  0xe1   :  { %532 = vmatprep.subr.bf16.mxu1 %v531_v18 }
  0xe2   :  { %534 = vmatpush3.bf16.msra.mxu1 %v531_v18 }
  0xe5   :  { %512 = vmatmul.mubr.msk.f32.vlgmr.msra.gmra.mrb[0].mxu1 %vm117_vm1, %v20_v5 }
  0xe6   :  { %523 = vmatprep.mubr.msk.f32.mxu1 %vm117_vm1, %v289_v22 }
 0x1b8   :  { %v513_v20 = vpop.f32.mrb[0].mxu1 }
 0x1b9   :  { %v188_v21 = vpop.f32.mrb[1].mxu1 }
 0x1ba   :  { %516 = vmatprep.mubr.msk.f32.mxu0 %vm31_vm0, %v188_v21 }
 0x1bb   :  { %517 = vmatmul.mubr.msk.f32.vlgmr.msra.gmra.mrb[2].mxu0 %vm31_vm0, %v513_v20 }
 0x1bc   :  { %527 = vmatpush3.msra.mxu0 %v14_v0 }
 0x28e   :  { %v518_v25 = vpop.f32.mrb[2].mxu0 }
 0x28f   :  { %v283_v26 = vadd.f32 %v518_v25, %v203_v24  ;;  %v277_v27 = vpop.f32.mrb[3].mxu0 }
 0x290   :  { %v278_v28 = vadd.f32 %v277_v27, %v199_v23 }
 0x291   :  { %v287_v29 = vmax.f32 %v283_v26, 0.0 }
 0x292   :  { %v286_v30 = vmax.f32 %v278_v28, 0.0 }
 0x294   :  { %v535_v31 = vpack.c.bf16 %v287_v29, %v286_v30 }
 0x296   :  { %536 = vmatprep.subr.bf16.mxu1 %v535_v31 }
 0x297   :  { %538 = vmatpush3.bf16.msra.mxu1 %v535_v31 }
 0x29a   :  { %524 = vmatmul.mubr.msk.f32.vlgmr.msra.gmra.mrb[2].mxu1 %vm117_vm1, %v291_v32 }
 0x36d   :  { %v525_v33 = vpop.f32.mrb[2].mxu1 }
 0x36e   :  { %v362_v34 = vpop.f32.mrb[3].mxu1 }
 0x36f   :  { %528 = vmatprep.mubr.msk.f32.mxu0 %vm31_vm0, %v362_v34  ;;  %v464_v38 = vsel %vm463_vm3, %v362_v34, 0.0 }
 0x370   :  { %529 = vmatmul.mubr.msk.f32.vlgmr.msra.gmra.mrb[4].mxu0 %vm31_vm0, %v525_v33 }
 0x443   :  { %v530_v35 = vpop.f32.mrb[4].mxu0 }
 0x444   :  { %v443_v36 = vpop.f32.mrb[5].mxu0 }
 0x445   :  { %v452_v37 = vsel %vm451_vm2, %v443_v36, -inf }
 0x446   :  { %453 = vmax.xlane.f32.xlu0 %v452_v37 }
 0x44a   :  { %465 = vadd.xlane.f32.xlu0 %v464_v38 }
 0x4d3   :  { %v454_v39 = vpop.xlane.xlu0 %453 }
 0x4d4   :  { %v455_v40 = vsub.f32 %v443_v36, %v454_v39 }
 0x4d6   :  { %v456_v41 = vmul.f32 1.442695, %v455_v40 }
 0x4d7   :  { %v466_v42 = vpop.xlane.xlu0 %465 }
 0x4d8   :  { %545 = vpow2.f32 %v456_v41  ;;  %v468_v43 = vmul.f32 0.125, %v466_v42 }
 0x4da   :  { %470 = vst.msk [vmem:[%s615_s3] sm:$0x2] %vm463_vm3, %v468_v43 }
 0x4e2   :  { %v546_v44 = vpop.eup %545 }
 0x4e3   :  { %v458_v45 = vsel %vm451_vm2, %v546_v44, 0.0 }
 0x4e4   :  { %459 = vadd.xlane.f32.xlu1 %v458_v45 }
 0x571   :  { %v460_v46 = vpop.xlane.xlu1 %459 }
 0x572   :  { %547 = vrcp.f32 %v460_v46 }
 0x57c   :  { %v548_v47 = vpop.eup %547 }
 0x57d   :  { %v462_v48 = vmul.f32 %v548_v47, %v546_v44 }
 0x57f   :  { %469 = vst.msk [vmem:[%s615_s3] sm:$0x1] %vm451_vm2, %v462_v48 }

</bundles_post_ra>
